<compile_context>
chip_gen: v5e
topology: v5e:2x2
jax: 0.10.0
libtpu: 0.0.40
codegen_flags: <defaults>
</compile_context>

<pallas_src>
import functools

import jax
import jax.numpy as jnp
from jax.experimental import pallas as pl
from jax.experimental.pallas import tpu as pltpu


# ---------------------------------------------------------------------------
# Kernel 1: per-pixel softmax prob of target class + per-pixel NLL
#   block: pred (1, C, T)   target (1, 1, T)   outputs (1, 1, T)
#   all reductions are over the class axis (sublanes); outputs are lane-dense.
# ---------------------------------------------------------------------------
def _softmax_nll_kernel(pred_ref, tgt_ref, prob_ref, nll_ref):
    logits = pred_ref[0].astype(jnp.float32)                  # (C, T)
    tgt = tgt_ref[0]                                          # (1, T) int32

    m = jnp.max(logits, axis=0, keepdims=True)                # (1, T)
    e = jnp.exp(logits - m)                                   # (C, T)  (only exp)
    s = jnp.sum(e, axis=0, keepdims=True)                     # (1, T)

    cls = jax.lax.broadcasted_iota(jnp.int32, logits.shape, 0)
    onehot = cls == tgt                                       # (C, T)
    e_t = jnp.sum(jnp.where(onehot, e, 0.0), axis=0, keepdims=True)        # (1, T)
    logit_t = jnp.sum(jnp.where(onehot, logits, 0.0), axis=0, keepdims=True)

    # prob of the target class (exact divide keeps the OHEM rank selection stable)
    prob_ref[0] = e_t / s
    # nll = -(logit_t - m - log s)
    nll_ref[0] = jnp.log(s) - (logit_t - m)


def softmax_target_prob_nll(pred3, tgt3, *, tile_n=2048):
    b, c, hw = pred3.shape
    tile = hw if hw <= tile_n else tile_n
    if tile != hw:
        assert tile % 128 == 0, "tile_n must be a multiple of 128"
    grid = (b, pl.cdiv(hw, tile))
    return pl.pallas_call(
        _softmax_nll_kernel,
        out_shape=(jax.ShapeDtypeStruct((b, 1, hw), jnp.float32),
                   jax.ShapeDtypeStruct((b, 1, hw), jnp.float32)),
        grid_spec=pltpu.PrefetchScalarGridSpec(
            num_scalar_prefetch=0,
            grid=grid,
            in_specs=[pl.BlockSpec((1, c, tile), lambda i, j: (i, 0, j)),
                      pl.BlockSpec((1, 1, tile), lambda i, j: (i, 0, j))],
            out_specs=[pl.BlockSpec((1, 1, tile), lambda i, j: (i, 0, j)),
                       pl.BlockSpec((1, 1, tile), lambda i, j: (i, 0, j))]),
        compiler_params=pltpu.CompilerParams(
            dimension_semantics=("parallel", "parallel"),
            vmem_limit_bytes=32 * 1024 * 1024),
    )(pred3, tgt3)


# ---------------------------------------------------------------------------
# Kernel 2: masked sum / count with lane-dense (1, TILE) vector accumulators.
# Ragged tail tiles are guarded with an in-kernel column-index mask.
# ---------------------------------------------------------------------------
def _masked_sum_kernel(nll_ref, mask_ref, s_ref, c_ref, *, hw, tile):
    i = pl.program_id(0)
    j = pl.program_id(1)

    @pl.when(jnp.logical_and(i == 0, j == 0))
    def _():
        s_ref[...] = jnp.zeros_like(s_ref)
        c_ref[...] = jnp.zeros_like(c_ref)

    nll = nll_ref[0]                                          # (1, T)
    msk = mask_ref[0]                                         # (1, T)
    col = j * tile + jax.lax.broadcasted_iota(jnp.int32, nll.shape, 1)
    in_bounds = col < hw                                      # guards ragged tail
    s_ref[...] += jnp.where(in_bounds, nll * msk, 0.0)
    c_ref[...] += jnp.where(in_bounds, msk, 0.0)


def masked_sum_count(nll3, mask3, *, tile_n=2048):
    b, _, hw = nll3.shape
    tile = hw if hw <= tile_n else tile_n
    if tile != hw:
        assert tile % 128 == 0, "tile_n must be a multiple of 128"
    grid = (b, pl.cdiv(hw, tile))
    kernel = functools.partial(_masked_sum_kernel, hw=hw, tile=tile)
    return pl.pallas_call(
        kernel,
        out_shape=(jax.ShapeDtypeStruct((1, tile), jnp.float32),
                   jax.ShapeDtypeStruct((1, tile), jnp.float32)),
        grid_spec=pltpu.PrefetchScalarGridSpec(
            num_scalar_prefetch=0,
            grid=grid,
            in_specs=[pl.BlockSpec((1, 1, tile), lambda i, j: (i, 0, j)),
                      pl.BlockSpec((1, 1, tile), lambda i, j: (i, 0, j))],
            out_specs=[pl.BlockSpec((1, tile), lambda i, j: (0, 0)),
                       pl.BlockSpec((1, tile), lambda i, j: (0, 0))]),
        compiler_params=pltpu.CompilerParams(
            dimension_semantics=("arbitrary", "arbitrary")),
    )(nll3, mask3)


# ---------------------------------------------------------------------------
# Forward pass (mirrors ProbOhemCrossEntropy2d.forward, use_weight=False,
# reduction='mean')
# ---------------------------------------------------------------------------
@functools.partial(jax.jit, static_argnames=("ignore_label", "thresh",
                                             "min_kept", "tile_n"))
def prob_ohem_cross_entropy_2d(pred, target, *, ignore_label=255,
                               thresh=0.6, min_kept=256, tile_n=2048):
    b, c, h, w = pred.shape
    hw = h * w
    n = b * hw

    # Pure reshapes only -- no NCHW->NHWC transpose, no cast, no pad of pred.
    pred3 = pred.reshape(b, c, hw)
    tgt3 = target.reshape(b, 1, hw).astype(jnp.int32)
    valid3 = tgt3 != ignore_label
    tgt_clean = jnp.where(valid3, tgt3, 0)

    prob3, nll3 = softmax_target_prob_nll(pred3, tgt_clean, tile_n=tile_n)

    valid_flat = valid3.reshape(-1)
    num_valid = valid_flat.sum()
    prob_t = prob3.reshape(-1)

    # --- OHEM selection (JAX glue) ---
    # TODO(synk): the kth-smallest selection (torch.sort) has no clean Pallas TPU
    # equivalent; done with lax.top_k (k = min_kept << N) in plain JAX.
    mask_prob = jnp.where(valid_flat, prob_t, 1.0)
    if min_kept > 0:
        k = min(n, min_kept)
        neg_topk, _ = jax.lax.top_k(-mask_prob, k)   # k smallest, far cheaper than full sort
        kth = -neg_topk[k - 1]
        threshold = jnp.maximum(kth, jnp.float32(thresh))
    else:
        threshold = jnp.float32(thresh)
    kept_mask = mask_prob <= threshold
    ohem_valid = jnp.logical_and(valid_flat, kept_mask)

    # PyTorch: OHEM filtering applies only when min_kept <= num_valid and num_valid > 0.
    use_ohem = jnp.logical_and(num_valid >= min_kept, num_valid > 0)
    final_valid = jnp.where(use_ohem, ohem_valid, valid_flat)
    mask3 = final_valid.reshape(b, 1, hw).astype(jnp.float32)

    s_vec, c_vec = masked_sum_count(nll3, mask3, tile_n=tile_n)
    # CrossEntropyLoss(reduction='mean', ignore_index=...): sum / count
    return jnp.sum(s_vec) / jnp.sum(c_vec)


# ---------------------------------------------------------------------------
# Pure-JAX reference for verification
# ---------------------------------------------------------------------------
def _ref_loss(pred, target, ignore_label, thresh, min_kept):
    b, c, h, w = pred.shape
    n = b * h * w
    tflat = target.reshape(-1)
    valid = tflat != ignore_label
    num_valid = valid.sum()
    tclean = jnp.where(valid, tflat, 0)
    logits = jnp.transpose(pred, (0, 2, 3, 1)).reshape(n, c).astype(jnp.float32)
    logp = jax.nn.log_softmax(logits, axis=-1)
    logp_t = jnp.take_along_axis(logp, tclean[:, None], axis=-1)[:, 0]
    prob_t = jnp.exp(logp_t)
    mask_prob = jnp.where(valid, prob_t, 1.0)
    k = min(n, min_kept)
    kth = jnp.sort(mask_prob)[k - 1]
    threshold = jnp.maximum(kth, thresh)
    kept = mask_prob <= threshold
    use_ohem = jnp.logical_and(num_valid >= min_kept, num_valid > 0)
    fv = jnp.where(use_ohem, valid & kept, valid)
    nll = -logp_t
    return jnp.sum(nll * fv) / jnp.sum(fv)


if __name__ == "__main__":
    key = jax.random.PRNGKey(0)
    k1, k2, k3 = jax.random.split(key, 3)

    B, C, H, W = 2, 19, 16, 16
    IGNORE = 255

    pred = jax.random.normal(k1, (B, C, H, W), dtype=jnp.float32)
    target = jax.random.randint(k2, (B, H, W), 0, C, dtype=jnp.int32)
    # mark ~10% of pixels as ignore
    ign = jax.random.uniform(k3, (B, H, W)) < 0.1
    target = jnp.where(ign, IGNORE, target)

    loss = prob_ohem_cross_entropy_2d(pred, target, ignore_label=IGNORE,
                                      thresh=0.6, min_kept=256)
    loss = jax.block_until_ready(loss)

    ref = _ref_loss(pred, target, IGNORE, 0.6, 256)
    assert jnp.allclose(loss, ref, rtol=1e-5, atol=1e-5), (loss, ref)

    print("KERNEL_OK")
</pallas_src>

<mosaic_0001>
module attributes {stable_mosaic.version = 11 : i64} {
  func.func @_softmax_nll_kernel(%arg0: i32, %arg1: i32, %arg2: memref<1x19x256xf32, #tpu.memory_space<vmem>>, %arg3: memref<1x1x256xi32, #tpu.memory_space<vmem>>, %arg4: memref<1x1x256xf32, #tpu.memory_space<vmem>>, %arg5: memref<1x1x256xf32, #tpu.memory_space<vmem>>) attributes {dimension_semantics = [#tpu.dimension_semantics<parallel>, #tpu.dimension_semantics<parallel>], iteration_bounds = array<i64: 2, 1>, scalar_prefetch = 0 : i64, scratch_operands = 0 : i64, tpu.core_type = #tpu.core_type<tc>, window_params = [{transform_indices = @transform_0, window_bounds = array<i64: 1, 19, 256>}, {transform_indices = @transform_1, window_bounds = array<i64: 1, 1, 256>}, {transform_indices = @transform_2, window_bounds = array<i64: 1, 1, 256>}, {transform_indices = @transform_3, window_bounds = array<i64: 1, 1, 256>}]} {
    %c0 = arith.constant 0 : index
    %c0_0 = arith.constant 0 : index
    %c0_1 = arith.constant 0 : index
    %0 = vector.load %arg2[%c0, %c0_0, %c0_1] : memref<1x19x256xf32, #tpu.memory_space<vmem>>, vector<1x19x256xf32>
    %1 = vector.shape_cast %0 : vector<1x19x256xf32> to vector<19x256xf32>
    %c0_2 = arith.constant 0 : index
    %c0_3 = arith.constant 0 : index
    %c0_4 = arith.constant 0 : index
    %2 = vector.load %arg3[%c0_2, %c0_3, %c0_4] : memref<1x1x256xi32, #tpu.memory_space<vmem>>, vector<1x1x256xi32>
    %3 = vector.shape_cast %2 : vector<1x1x256xi32> to vector<1x256xi32>
    %cst = arith.constant dense<0xFF800000> : vector<256xf32>
    %4 = vector.multi_reduction <maximumf>, %1, %cst [0] : vector<19x256xf32> to vector<256xf32>
    %5 = vector.shape_cast %4 : vector<256xf32> to vector<1x256xf32>
    %6 = vector.broadcast %5 : vector<1x256xf32> to vector<19x256xf32>
    %7 = arith.subf %1, %6 : vector<19x256xf32>
    %8 = math.exp %7 : vector<19x256xf32>
    %cst_5 = arith.constant dense<0.000000e+00> : vector<256xf32>
    %9 = vector.multi_reduction <add>, %8, %cst_5 [0] : vector<19x256xf32> to vector<256xf32>
    %10 = vector.shape_cast %9 : vector<256xf32> to vector<1x256xf32>
    %11 = tpu.iota {dimensions = array<i32: 0>} : vector<19x256xi32>
    %12 = vector.broadcast %3 : vector<1x256xi32> to vector<19x256xi32>
    %13 = arith.cmpi eq, %11, %12 : vector<19x256xi32>
    %cst_6 = arith.constant 0.000000e+00 : f32
    %14 = vector.broadcast %cst_6 : f32 to vector<19x256xf32>
    %15 = arith.select %13, %8, %14 : vector<19x256xi1>, vector<19x256xf32>
    %cst_7 = arith.constant dense<0.000000e+00> : vector<256xf32>
    %16 = vector.multi_reduction <add>, %15, %cst_7 [0] : vector<19x256xf32> to vector<256xf32>
    %17 = vector.shape_cast %16 : vector<256xf32> to vector<1x256xf32>
    %cst_8 = arith.constant 0.000000e+00 : f32
    %18 = vector.broadcast %cst_8 : f32 to vector<19x256xf32>
    %19 = arith.select %13, %1, %18 : vector<19x256xi1>, vector<19x256xf32>
    %cst_9 = arith.constant dense<0.000000e+00> : vector<256xf32>
    %20 = vector.multi_reduction <add>, %19, %cst_9 [0] : vector<19x256xf32> to vector<256xf32>
    %21 = vector.shape_cast %20 : vector<256xf32> to vector<1x256xf32>
    %22 = arith.divf %17, %10 : vector<1x256xf32>
    %c0_10 = arith.constant 0 : index
    %c0_11 = arith.constant 0 : index
    %c0_12 = arith.constant 0 : index
    %23 = vector.load %arg4[%c0_10, %c0_11, %c0_12] : memref<1x1x256xf32, #tpu.memory_space<vmem>>, vector<1x1x256xf32>
    %24 = vector.shape_cast %23 : vector<1x1x256xf32> to vector<1x256xf32>
    %25 = vector.shape_cast %22 : vector<1x256xf32> to vector<1x1x256xf32>
    tpu.vector_store %arg4[%c0_10, %c0_11, %c0_12], %25 {strides = array<i32>} : memref<1x1x256xf32, #tpu.memory_space<vmem>>, vector<1x1x256xf32>,
    %26 = math.log %10 : vector<1x256xf32>
    %27 = arith.subf %21, %5 : vector<1x256xf32>
    %28 = arith.subf %26, %27 : vector<1x256xf32>
    %c0_13 = arith.constant 0 : index
    %c0_14 = arith.constant 0 : index
    %c0_15 = arith.constant 0 : index
    %29 = vector.load %arg5[%c0_13, %c0_14, %c0_15] : memref<1x1x256xf32, #tpu.memory_space<vmem>>, vector<1x1x256xf32>
    %30 = vector.shape_cast %29 : vector<1x1x256xf32> to vector<1x256xf32>
    %31 = vector.shape_cast %28 : vector<1x256xf32> to vector<1x1x256xf32>
    tpu.vector_store %arg5[%c0_13, %c0_14, %c0_15], %31 {strides = array<i32>} : memref<1x1x256xf32, #tpu.memory_space<vmem>>, vector<1x1x256xf32>,
    return
  }
  func.func @transform_0(%arg0: i32, %arg1: i32) -> (i32, i32, i32) {
    %c0_i32 = arith.constant 0 : i32
    %c0_i32_0 = arith.constant 0 : i32
    return %arg0, %c0_i32, %arg1 : i32, i32, i32
  }
  func.func @transform_1(%arg0: i32, %arg1: i32) -> (i32, i32, i32) {
    %c0_i32 = arith.constant 0 : i32
    %c0_i32_0 = arith.constant 0 : i32
    return %arg0, %c0_i32, %arg1 : i32, i32, i32
  }
  func.func @transform_2(%arg0: i32, %arg1: i32) -> (i32, i32, i32) {
    %c0_i32 = arith.constant 0 : i32
    %c0_i32_0 = arith.constant 0 : i32
    return %arg0, %c0_i32, %arg1 : i32, i32, i32
  }
  func.func @transform_3(%arg0: i32, %arg1: i32) -> (i32, i32, i32) {
    %c0_i32 = arith.constant 0 : i32
    %c0_i32_0 = arith.constant 0 : i32
    return %arg0, %c0_i32, %arg1 : i32, i32, i32
  }
}

module attributes {stable_mosaic.version = 11 : i64} {
  func.func @_masked_sum_kernel(%arg0: i32, %arg1: i32, %arg2: memref<1x1x256xf32, #tpu.memory_space<vmem>>, %arg3: memref<1x1x256xf32, #tpu.memory_space<vmem>>, %arg4: memref<1x256xf32, #tpu.memory_space<vmem>>, %arg5: memref<1x256xf32, #tpu.memory_space<vmem>>) attributes {dimension_semantics = [#tpu.dimension_semantics<arbitrary>, #tpu.dimension_semantics<arbitrary>], iteration_bounds = array<i64: 2, 1>, scalar_prefetch = 0 : i64, scratch_operands = 0 : i64, tpu.core_type = #tpu.core_type<tc>, window_params = [{transform_indices = @transform_0, window_bounds = array<i64: 1, 1, 256>}, {transform_indices = @transform_1, window_bounds = array<i64: 1, 1, 256>}, {pipeline_mode = #tpu.pipeline_mode<synchronous>, transform_indices = @transform_2, window_bounds = array<i64: 1, 256>}, {pipeline_mode = #tpu.pipeline_mode<synchronous>, transform_indices = @transform_3, window_bounds = array<i64: 1, 256>}]} {
    %c0_i32 = arith.constant 0 : i32
    %0 = arith.cmpi eq, %arg0, %c0_i32 : i32
    %c0_i32_0 = arith.constant 0 : i32
    %1 = arith.cmpi eq, %arg1, %c0_i32_0 : i32
    %2 = arith.andi %0, %1 : i1
    %3 = arith.extui %2 : i1 to i32
    %c0_i32_1 = arith.constant 0 : i32
    %4 = arith.cmpi ne, %3, %c0_i32_1 : i32
    scf.if %4 {
      %cst_17 = arith.constant 0.000000e+00 : f32
      %26 = vector.broadcast %cst_17 : f32 to vector<1x256xf32>
      %c0_18 = arith.constant 0 : index
      %c0_19 = arith.constant 0 : index
      %27 = vector.load %arg4[%c0_18, %c0_19] : memref<1x256xf32, #tpu.memory_space<vmem>>, vector<1x256xf32>
      tpu.vector_store %arg4[%c0_18, %c0_19], %26 {strides = array<i32>} : memref<1x256xf32, #tpu.memory_space<vmem>>, vector<1x256xf32>,
      %cst_20 = arith.constant 0.000000e+00 : f32
      %28 = vector.broadcast %cst_20 : f32 to vector<1x256xf32>
      %c0_21 = arith.constant 0 : index
      %c0_22 = arith.constant 0 : index
      %29 = vector.load %arg5[%c0_21, %c0_22] : memref<1x256xf32, #tpu.memory_space<vmem>>, vector<1x256xf32>
      tpu.vector_store %arg5[%c0_21, %c0_22], %28 {strides = array<i32>} : memref<1x256xf32, #tpu.memory_space<vmem>>, vector<1x256xf32>,
    } else {
    }
    %c0 = arith.constant 0 : index
    %c0_2 = arith.constant 0 : index
    %c0_3 = arith.constant 0 : index
    %5 = vector.load %arg2[%c0, %c0_2, %c0_3] : memref<1x1x256xf32, #tpu.memory_space<vmem>>, vector<1x1x256xf32>
    %6 = vector.shape_cast %5 : vector<1x1x256xf32> to vector<1x256xf32>
    %c0_4 = arith.constant 0 : index
    %c0_5 = arith.constant 0 : index
    %c0_6 = arith.constant 0 : index
    %7 = vector.load %arg3[%c0_4, %c0_5, %c0_6] : memref<1x1x256xf32, #tpu.memory_space<vmem>>, vector<1x1x256xf32>
    %8 = vector.shape_cast %7 : vector<1x1x256xf32> to vector<1x256xf32>
    %c256_i32 = arith.constant 256 : i32
    %9 = arith.muli %arg1, %c256_i32 : i32
    %10 = tpu.iota {dimensions = array<i32: 1>} : vector<1x256xi32>
    %11 = vector.broadcast %9 : i32 to vector<1x256xi32>
    %12 = arith.addi %11, %10 : vector<1x256xi32>
    %c256_i32_7 = arith.constant 256 : i32
    %13 = vector.broadcast %c256_i32_7 : i32 to vector<1x256xi32>
    %14 = arith.cmpi slt, %12, %13 : vector<1x256xi32>
    %c0_8 = arith.constant 0 : index
    %c0_9 = arith.constant 0 : index
    %15 = vector.load %arg4[%c0_8, %c0_9] : memref<1x256xf32, #tpu.memory_space<vmem>>, vector<1x256xf32>
    %16 = arith.mulf %6, %8 : vector<1x256xf32>
    %cst = arith.constant 0.000000e+00 : f32
    %17 = vector.broadcast %cst : f32 to vector<1x256xf32>
    %18 = arith.select %14, %16, %17 : vector<1x256xi1>, vector<1x256xf32>
    %19 = arith.addf %15, %18 : vector<1x256xf32>
    %c0_10 = arith.constant 0 : index
    %c0_11 = arith.constant 0 : index
    %20 = vector.load %arg4[%c0_10, %c0_11] : memref<1x256xf32, #tpu.memory_space<vmem>>, vector<1x256xf32>
    tpu.vector_store %arg4[%c0_10, %c0_11], %19 {strides = array<i32>} : memref<1x256xf32, #tpu.memory_space<vmem>>, vector<1x256xf32>,
    %c0_12 = arith.constant 0 : index
    %c0_13 = arith.constant 0 : index
    %21 = vector.load %arg5[%c0_12, %c0_13] : memref<1x256xf32, #tpu.memory_space<vmem>>, vector<1x256xf32>
    %cst_14 = arith.constant 0.000000e+00 : f32
    %22 = vector.broadcast %cst_14 : f32 to vector<1x256xf32>
    %23 = arith.select %14, %8, %22 : vector<1x256xi1>, vector<1x256xf32>
    %24 = arith.addf %21, %23 : vector<1x256xf32>
    %c0_15 = arith.constant 0 : index
    %c0_16 = arith.constant 0 : index
    %25 = vector.load %arg5[%c0_15, %c0_16] : memref<1x256xf32, #tpu.memory_space<vmem>>, vector<1x256xf32>
    tpu.vector_store %arg5[%c0_15, %c0_16], %24 {strides = array<i32>} : memref<1x256xf32, #tpu.memory_space<vmem>>, vector<1x256xf32>,
    return
  }
  func.func @transform_0(%arg0: i32, %arg1: i32) -> (i32, i32, i32) {
    %c0_i32 = arith.constant 0 : i32
    %c0_i32_0 = arith.constant 0 : i32
    return %arg0, %c0_i32, %arg1 : i32, i32, i32
  }
  func.func @transform_1(%arg0: i32, %arg1: i32) -> (i32, i32, i32) {
    %c0_i32 = arith.constant 0 : i32
    %c0_i32_0 = arith.constant 0 : i32
    return %arg0, %c0_i32, %arg1 : i32, i32, i32
  }
  func.func @transform_2(%arg0: i32, %arg1: i32) -> (i32, i32) {
    %c0_i32 = arith.constant 0 : i32
    %c0_i32_0 = arith.constant 0 : i32
    %c0_i32_1 = arith.constant 0 : i32
    return %c0_i32, %c0_i32_0 : i32, i32
  }
  func.func @transform_3(%arg0: i32, %arg1: i32) -> (i32, i32) {
    %c0_i32 = arith.constant 0 : i32
    %c0_i32_0 = arith.constant 0 : i32
    %c0_i32_1 = arith.constant 0 : i32
    return %c0_i32, %c0_i32_0 : i32, i32
  }
}

</mosaic_0001>

<bundles_post_ra>
// kernel: prob_ohem_cross_entropy_2d.2
= control target key start
LH: loop header
LB: loop body
LE: loop exit
PB: predicated region body
PF: predicated region fallthrough
CT: control target
= control target key end

     0   :  { %s680_s12 = smov 0   ;;  %s682_s13 = smov 0   ;;  %s795_s0 = inlined_call_operand.vmem [shape: f32[2,19,256], index: 0, kind: input, shape index: {}]   ;;  %s796_s1 = inlined_call_operand.vmem [shape: s32[2,1,256], index: 1, kind: input, shape index: {}]   ;;  %s797_s2 = inlined_call_operand.vmem [shape: f32[2,1,256], index: 2, kind: output, shape index: {0}]   ;;  %s798_s3 = inlined_call_operand.vmem [shape: f32[2,1,256], index: 3, kind: output, shape index: {1}]  }
   0x1   :  { %s684_s14 = smov 0  }
   0x2 LB: > { %s26_s15 = sadd.s32 1, %s654_s13  ;;  %p584_p0 = scmp.ge.s32.totalorder %s658_s14, 1  ;;  %s658_s14 = sphi %s684_s14, %s14_s14   ;;  %s654_s13 = sphi %s682_s13, %s804_s13   ;;  %s650_s12 = sphi %s680_s12, %s803_s12  }
   0x3   : > { %p28_p1 = scmp.ge.s32.totalorder %s26_s15, 2  ;;  %p179_p2 = scmp.lt.s32.totalorder %s658_s14, 3 }
   0x5   : > { %s806_s15 = smov (%p28_p1, %s26_s15), 0  ;;  %p180_p3 = pnand %p584_p0, %p179_p2 }
   0x6   : > { %p227_p4 = scmp.lt.s32.totalorder (!%p180_p3), %s650_s12, 1 }
   0x7   : > { %183 = sbr.rel (%p180_p3) target bundleno = 89 (0x59), region = 28 }
   0xc   : > { %s808_s12 = smov (!%p227_p4, %s650_s12), 1  ;;  %vm270_vm0 = vcmask 1042432   ;;  %v325_v16 = vlaneseq  ;;  %vm418_vm11 = vcmask 1040384  }
   0xd   : > { %s591_s16 = smul.u32 48, %s808_s12  ;;  %s703_s20 = sshll.u32 %s808_s12, 1 }
   0xe   : > { %s243_s23 = scalar_lea.vmem %s796_s1, %s703_s20  ;;  %v326_v20 = vshrl.u32 %v325_v16, 7  ;;  %vm760_vm12 = vcmp.lt.s32.totalorder %v325_v16, 256  ;;  %s261_s26 = scalar_lea.vmem %s798_s3, %s703_s20 }
   0xf   : > { %s234_s19 = scalar_lea.vmem %s795_s0, %s591_s16  ;;  %v269_v17 = vld [vmem:[%s243_s23] sm:$0x3]  ;;  %s252_s29 = scalar_lea.vmem %s797_s2, %s703_s20 }
  0x10   : > { %v263_v0 = vld [vmem:[%s234_s19] sm:$0xff]  ;;  %v264_v1 = vld [vmem:[%s234_s19 + $0x8] sm:$0xff]  ;;  %v265_v4 = vld [vmem:[%s234_s19 + $0x10] sm:$0xff]  ;;  %v327_v23 = vadd.s32 8, %v326_v20  ;;  %v710_v24 = vperm.slane %v269_v17, 1  ;;  %v712_v25 = vadd.s32 16, %v326_v20 }
  0x11   : > { %v267_v2 = vld [vmem:[%s234_s19 + $0x20] sm:$0x7]  ;;  %v268_v3 = vld [vmem:[%s234_s19 + $0x28] sm:$0x7]  ;;  %v266_v5 = vld [vmem:[%s234_s19 + $0x18] sm:$0xff]  ;;  %v329_v28 = vperm.slane %v269_v17, 0 }
  0x12   : > { %v271_v6 = vsel %vm270_vm0, %v267_v2, -inf  ;;  %v280_v7 = vsel %vm270_vm0, %v268_v3, -inf  ;;  %vm332_vm1 = vcmp.eq.s32.totalorder %v326_v20, %v710_v24  ;;  %vm334_vm2 = vcmp.eq.s32.totalorder %v327_v23, %v710_v24 }
  0x13   : > { %v272_v8 = vmax.f32 %v263_v0, %v271_v6  ;;  %v281_v9 = vmax.f32 %v264_v1, %v280_v7  ;;  %vm336_vm3 = vcmp.eq.s32.totalorder %v712_v25, %v710_v24  ;;  %v362_v29 = vsel %vm332_vm1, %v264_v1, 0.0 }
  0x14   : > { %vm331_vm4 = vcmp.eq.s32.totalorder %v326_v20, %v329_v28  ;;  %vm333_vm5 = vcmp.eq.s32.totalorder %v327_v23, %v329_v28  ;;  %vm335_vm6 = vcmp.eq.s32.totalorder %v712_v25, %v329_v28  ;;  %v364_v34 = vsel %vm334_vm2, %v266_v5, 0.0 }
  0x15   : > { %v273_v10 = vmax.f32 %v272_v8, %v265_v4  ;;  %v282_v11 = vmax.f32 %v281_v9, %v266_v5  ;;  %v361_v32 = vsel %vm331_vm4, %v263_v0, 0.0  ;;  %v363_v33 = vsel %vm333_vm5, %v265_v4, 0.0 }
  0x16   : > { %v365_v41 = vsel %vm335_vm6, %v267_v2, 0.0  ;;  %v366_v42 = vsel %vm336_vm3, %v268_v3, 0.0  ;;  %v367_v46 = vadd.f32 %v363_v33, %v361_v32  ;;  %v376_v48 = vadd.f32 %v364_v34, %v362_v29 }
  0x17   : > { %v274_v12 = vrot.slane %v273_v10, 4  ;;  %v283_v13 = vrot.slane %v282_v11, 4  ;;  %v368_v50 = vsel %vm270_vm0, %v365_v41, 0.0  ;;  %v377_v51 = vsel %vm270_vm0, %v366_v42, 0.0 }
  0x18   : > { %v369_v53 = vadd.f32 %v368_v50, %v367_v46  ;;  %v378_v54 = vadd.f32 %v377_v51, %v376_v48 }
  0x19   : > { %v275_v14 = vmax.f32 %v273_v10, %v274_v12  ;;  %v284_v15 = vmax.f32 %v282_v11, %v283_v13 }
  0x1a   : > { %v370_v56 = vrot.slane %v369_v53, 4  ;;  %v379_v59 = vrot.slane %v378_v54, 4 }
  0x1b   : > { %v276_v18 = vrot.slane %v275_v14, 2  ;;  %v285_v19 = vrot.slane %v284_v15, 2 }
  0x1c   : > { %v380_v10 = vadd.f32 %v379_v59, %v378_v54 }
  0x1d   : > { %v277_v21 = vmax.f32 %v275_v14, %v276_v18  ;;  %v286_v22 = vmax.f32 %v284_v15, %v285_v19 }
  0x1f   : > { %v278_v26 = vrot.slane %v277_v21, 1  ;;  %v287_v27 = vrot.slane %v286_v22, 1 }
  0x21   : > { %v720_v30 = vmax.f32 %v277_v21, %v278_v26  ;;  %v722_v31 = vmax.f32 %v286_v22, %v287_v27  ;;  %v381_v26 = vrot.slane %v380_v10, 2 }
  0x23   : > { %v289_v35 = vsub.f32 %v263_v0, %v720_v30  ;;  %v290_v36 = vsub.f32 %v264_v1, %v722_v31  ;;  %v291_v37 = vsub.f32 %v265_v4, %v720_v30  ;;  %v292_v38 = vsub.f32 %v266_v5, %v722_v31 }
  0x24   : > { %v293_v39 = vsub.f32 %v267_v2, %v720_v30  ;;  %v294_v40 = vsub.f32 %v268_v3, %v722_v31  ;;  %v371_v5 = vadd.f32 %v370_v56, %v369_v53  ;;  %v382_v25 = vadd.f32 %v381_v26, %v380_v10 }
  0x25   : > { %v295_v43 = vmul.f32 1.442695, %v289_v35  ;;  %v297_v44 = vmul.f32 1.442695, %v290_v36  ;;  %v299_v45 = vmul.f32 1.442695, %v291_v37 }
  0x26   : > { %v301_v47 = vmul.f32 1.442695, %v292_v38  ;;  %v303_v49 = vmul.f32 1.442695, %v293_v39  ;;  %v305_v52 = vmul.f32 1.442695, %v294_v40 }
  0x27   : > { %616 = vpow2.f32 %v295_v43  ;;  %v372_v23 = vrot.slane %v371_v5, 2  ;;  %v383_v42 = vrot.slane %v382_v25, 1 }
  0x28   : > { %618 = vpow2.f32 %v297_v44 }
  0x29   : > { %620 = vpow2.f32 %v299_v45  ;;  %v373_v24 = vadd.f32 %v372_v23, %v371_v5 }
  0x2a   : > { %622 = vpow2.f32 %v301_v47  ;;  %v384_v47 = vadd.f32 %v383_v42, %v382_v25 }
  0x2b   : > { %624 = vpow2.f32 %v303_v49  ;;  %v374_v41 = vrot.slane %v373_v24, 1 }
  0x2c   : > { %626 = vpow2.f32 %v305_v52  ;;  %v431_v52 = vsub.f32 %v384_v47, %v722_v31 }
  0x2d   : > { %v617_v55 = vpop.eup %616  ;;  %v375_v46 = vadd.f32 %v374_v41, %v373_v24 }
  0x2e   : > { %v619_v57 = vpop.eup %618  ;;  %v337_v58 = vsel %vm331_vm4, %v617_v55, 0.0 }
  0x2f   : > { %v621_v60 = vpop.eup %620  ;;  %v338_v61 = vsel %vm332_vm1, %v619_v57, 0.0  ;;  %v430_v51 = vsub.f32 %v375_v46, %v720_v30 }
  0x30   : > { %v623_v62 = vpop.eup %622  ;;  %v307_v63 = vadd.f32 %v621_v60, %v617_v55  ;;  %v339_v0 = vsel %vm333_vm5, %v621_v60, 0.0 }
  0x31   : > { %v625_v1 = vpop.eup %624  ;;  %v316_v2 = vadd.f32 %v623_v62, %v619_v57  ;;  %v340_v3 = vsel %vm334_vm2, %v623_v62, 0.0  ;;  %v343_v4 = vadd.f32 %v339_v0, %v337_v58 }
  0x32   : > { %v627_v6 = vpop.eup %626  ;;  %v308_v7 = vsel %vm270_vm0, %v625_v1, 0.0  ;;  %v341_v8 = vsel %vm335_vm6, %v625_v1, 0.0  ;;  %v352_v9 = vadd.f32 %v340_v3, %v338_v61 }
  0x33   : > { %v309_v11 = vadd.f32 %v308_v7, %v307_v63  ;;  %v317_v12 = vsel %vm270_vm0, %v627_v6, 0.0  ;;  %v342_v13 = vsel %vm336_vm3, %v627_v6, 0.0  ;;  %v344_v14 = vsel %vm270_vm0, %v341_v8, 0.0 }
  0x34   : > { %v318_v15 = vadd.f32 %v317_v12, %v316_v2  ;;  %v345_v17 = vadd.f32 %v344_v14, %v343_v4  ;;  %v353_v18 = vsel %vm270_vm0, %v342_v13, 0.0 }
  0x35   : > { %v310_v19 = vrot.slane %v309_v11, 4  ;;  %v354_v20 = vadd.f32 %v353_v18, %v352_v9 }
  0x36   : > { %v319_v21 = vrot.slane %v318_v15, 4  ;;  %v346_v28 = vrot.slane %v345_v17, 4 }
  0x37   : > { %v311_v22 = vadd.f32 %v310_v19, %v309_v11  ;;  %v355_v29 = vrot.slane %v354_v20, 4 }
  0x38   : > { %v320_v27 = vadd.f32 %v319_v21, %v318_v15  ;;  %v347_v36 = vadd.f32 %v346_v28, %v345_v17 }
  0x39   : > { %v312_v32 = vrot.slane %v311_v22, 2  ;;  %v356_v37 = vadd.f32 %v355_v29, %v354_v20 }
  0x3a   : > { %v321_v33 = vrot.slane %v320_v27, 2  ;;  %v348_v44 = vrot.slane %v347_v36, 2 }
  0x3b   : > { %v313_v34 = vadd.f32 %v312_v32, %v311_v22  ;;  %v357_v45 = vrot.slane %v356_v37, 2 }
  0x3c   : > { %v322_v35 = vadd.f32 %v321_v33, %v320_v27  ;;  %v349_v48 = vadd.f32 %v348_v44, %v347_v36 }
  0x3d   : > { %v314_v38 = vrot.slane %v313_v34, 1  ;;  %v358_v49 = vadd.f32 %v357_v45, %v356_v37 }
  0x3e   : > { %v323_v39 = vrot.slane %v322_v35, 1  ;;  %v350_v54 = vrot.slane %v349_v48, 1 }
  0x3f   : > { %v315_v40 = vadd.f32 %v314_v38, %v313_v34  ;;  %v359_v55 = vrot.slane %v358_v49, 1 }
  0x40   : > { %v324_v43 = vadd.f32 %v323_v39, %v322_v35  ;;  %v351_v9 = vadd.f32 %v350_v54, %v349_v48 }
  0x41   : > { %628 = vrcp.f32 %v315_v40  ;;  %vm390_vm7 = vweird.f32 %v315_v40  ;;  %v394_v58 = vand.u32 2147483647, %v315_v40  ;;  %v396_v59 = vand.u32 2147483648, %v315_v40 }
  0x42   : > { %630 = vrcp.f32 %v324_v43  ;;  %vm405_vm8 = vweird.f32 %v324_v43  ;;  %v411_v63 = vand.u32 2147483648, %v324_v43  ;;  %v409_v30 = vand.u32 2147483647, %v324_v43 }
  0x43   : > { %632 = vlog2.f32 %v315_v40  ;;  %v397_v5 = vor.u32 1.1754944e-38, %v396_v59  ;;  %vm395_vm14 = vcmp.eq.f32.partialorder %v394_v58, 8.507059e+37  ;;  %v360_v16 = vadd.f32 %v359_v55, %v358_v49 }
  0x44   : > { %634 = vlog2.f32 %v324_v43  ;;  %v412_v11 = vor.u32 1.1754944e-38, %v411_v63  ;;  %vm410_vm0 = vcmp.eq.f32.partialorder %v409_v30, 8.507059e+37 }
  0x47   : > { %v629_v50 = vpop.eup %628 }
  0x48   : > { %v631_v53 = vpop.eup %630  ;;  %v386_v56 = vmul.f32 %v629_v50, %v315_v40  ;;  %vm391_vm9 = vweird.f32 %v629_v50 }
  0x49   : > { %v633_v57 = vpop.eup %632  ;;  %v401_v60 = vmul.f32 %v631_v53, %v324_v43  ;;  %vm406_vm10 = vweird.f32 %v631_v53  ;;  %vm765_vm13 = vmor %vm390_vm7, %vm391_vm9 }
  0x4a   : > { %v635_v61 = vpop.eup %634  ;;  %v387_v62 = vsub.f32 1.0, %v386_v56  ;;  %v427_v0 = vmul.f32 0.6931472, %v633_v57  ;;  %vm407_vm15 = vmor %vm405_vm8, %vm406_vm10 }
  0x4b   : > { %v402_v1 = vsub.f32 1.0, %v401_v60  ;;  %v429_v31 = vmul.f32 0.6931472, %v635_v61 }
  0x4c   : > { %v388_v2 = vmul.f32 %v629_v50, %v387_v62  ;;  %v432_v7 = vsub.f32 %v427_v0, %v430_v51 }
  0x4d   : > { %v403_v6 = vmul.f32 %v631_v53, %v402_v1  ;;  %v433_v8 = vsub.f32 %v429_v31, %v431_v52 }
  0x4e   : > { %v389_v10 = vadd.f32 %v629_v50, %v388_v2 }
  0x4f   : > { %v404_v12 = vadd.f32 %v631_v53, %v403_v6  ;;  %v436_v13 = vrot.slane %v433_v8, 7 }
  0x50   : > { %v393_v14 = vsel %vm765_vm13, %v629_v50, %v389_v10 }
  0x51   : > { %v398_v15 = vsel %vm395_vm14, %v397_v5, %v393_v14  ;;  %v408_v17 = vsel %vm407_vm15, %v631_v53, %v404_v12  ;;  %v437_v18 = vsel %vm418_vm11, %v432_v7, %v436_v13 }
  0x52   : > { %v413_v19 = vsel %vm410_vm0, %v412_v11, %v408_v17  ;;  %439 = vst.msk [vmem:[%s261_s26] sm:$0x3] %vm760_vm12, %v437_v18  ;;  %v399_v20 = vmul.f32 %v398_v15, %v351_v9 }
  0x53   : > { %v414_v21 = vmul.f32 %v413_v19, %v360_v16 }
  0x55   : > { %v417_v22 = vrot.slane %v414_v21, 7 }
  0x57   : > { %v419_v23 = vsel %vm418_vm11, %v399_v20, %v417_v22 }
  0x58   : > { %425 = vst.msk [vmem:[%s252_s29] sm:$0x3] %vm760_vm12, %v419_v23 }
  0x59 PF: > { %s14_s14 = sadd.s32 1, %s658_s14   ;;  %s803_s12 = smov %s654_s13 }
  0x5a   : > { %p11_p5 = scmp.ge.s32.totalorder %s14_s14, 4   ;;  %s804_s13 = smov %s806_s15 }
  0x5c   :  { %13 = sbr.rel (!%p11_p5) target bundleno = 2 (0x2), region = 73 }

// kernel: prob_ohem_cross_entropy_2d.3
= control target key start
LH: loop header
LB: loop body
LE: loop exit
PB: predicated region body
PF: predicated region fallthrough
CT: control target
= control target key end

     0   :  { %s411_s12 = smov 0   ;;  %s413_s13 = smov 0   ;;  %s462_s0 = inlined_call_operand.vmem [shape: f32[2,1,256], index: 0, kind: input, shape index: {}]   ;;  %s463_s1 = inlined_call_operand.vmem [shape: f32[2,1,256], index: 1, kind: input, shape index: {}]   ;;  %s464_s2 = inlined_call_operand.vmem [shape: f32[1,256], index: 2, kind: output, shape index: {0}]   ;;  %s465_s3 = inlined_call_operand.vmem [shape: f32[1,256], index: 3, kind: output, shape index: {1}]  }
   0x1   :  { %s415_s14 = smov 0  }
   0x2 LB: > { %s26_s15 = sadd.s32 1, %s384_s13  ;;  %p334_p0 = scmp.ge.s32.totalorder %s388_s14, 1  ;;  %s388_s14 = sphi %s415_s14, %s14_s14   ;;  %s384_s13 = sphi %s413_s13, %s467_s13   ;;  %s380_s12 = sphi %s411_s12, %s466_s12  }
   0x3   : > { %p28_p1 = scmp.ge.s32.totalorder %s26_s15, 2  ;;  %p164_p2 = scmp.lt.s32.totalorder %s388_s14, 3 }
   0x5   : > { %s469_s15 = smov (%p28_p1, %s26_s15), 0  ;;  %p165_p3 = pnand %p334_p0, %p164_p2 }
   0x6   : > { %p195_p4 = scmp.lt.s32.totalorder (!%p165_p3), %s380_s12, 1  ;;  %p212_p5 = scmp.eq.s32.totalorder (!%p165_p3), %s380_s12, 0 }
   0x7   : > { %168 = sbr.rel (%p165_p3) target bundleno = 29 (0x1d), region = 28 }
   0xc   : > { %s471_s12 = smov (!%p195_p4, %s380_s12), 1  ;;  %217 = sbr.rel (!%p212_p5) target bundleno = 17 (0x11), region = 32  ;;  %v218_v0 = vlaneseq (%p212_p5)  ;;  %v390_v1 = vmov (%p212_p5), 0.0  }
   0xd   : > { %s335_s16 = sshll.u32 %s471_s12, 1 }
   0xe   : > { %s201_s19 = scalar_lea.vmem %s462_s0, %s335_s16  ;;  %s210_s22 = scalar_lea.vmem %s463_s1, %s335_s16  ;;  %vm220_vm0 = vcmp.lt.s32.totalorder (%p212_p5), %v218_v0, 256 }
   0xf   : > { %222 = vst.msk [vmem:[%s464_s2] sm:$0x3] (%p212_p5), %vm220_vm0, %v390_v1 }
  0x10   : > { %223 = vst.msk [vmem:[%s465_s3] sm:$0x3] (%p212_p5), %vm220_vm0, %v390_v1 }
  0x11 PF: > { %v224_v2 = vld [vmem:[%s201_s19] sm:$0x3]  ;;  %v251_v5 = vlaneseq  ;;  %vm247_vm1 = vcmask 1040384  }
  0x12   : > { %v225_v3 = vld [vmem:[%s210_s22] sm:$0x3] }
  0x13   : > { %v236_v4 = vmul.f32 %v225_v3, %v224_v2  ;;  %v258_v6 = vperm.slane %v225_v3, 0  ;;  %v259_v7 = vperm.slane %v225_v3, 1  ;;  %vm253_vm2 = vcmp.lt.s32.totalorder %v251_v5, 256 }
  0x15   : > { %v238_v8 = vperm.slane %v236_v4, 0  ;;  %v239_v9 = vperm.slane %v236_v4, 1  ;;  %v266_v11 = vrot.slane %v259_v7, 7 }
  0x16   : > { %v235_v12 = vld [vmem:[%s464_s2] sm:$0x3] }
  0x17   : > { %v256_v10 = vld [vmem:[%s465_s3] sm:$0x3]  ;;  %v246_v13 = vrot.slane %v239_v9, 7  ;;  %v267_v14 = vsel %vm247_vm1, %v258_v6, %v266_v11 }
  0x18   : > { %v269_v15 = vadd.f32 %v267_v14, %v256_v10 }
  0x19   : > { %v248_v16 = vsel %vm247_vm1, %v238_v8, %v246_v13 }
  0x1a   : > { %v250_v17 = vadd.f32 %v248_v16, %v235_v12  ;;  %270 = vst.msk [vmem:[%s465_s3] sm:$0x3] %vm253_vm2, %v269_v15 }
  0x1c   : > { %255 = vst.msk [vmem:[%s464_s2] sm:$0x3] %vm253_vm2, %v250_v17 }
  0x1d PF: > { %s14_s14 = sadd.s32 1, %s388_s14   ;;  %s466_s12 = smov %s384_s13 }
  0x1e   : > { %p11_p6 = scmp.ge.s32.totalorder %s14_s14, 4   ;;  %s467_s13 = smov %s469_s15 }
  0x20   :  { %13 = sbr.rel (!%p11_p6) target bundleno = 2 (0x2), region = 69 }

</bundles_post_ra>
